<compile_context>
chip_gen: v6e
topology: v6e:2x2x1
jax: 0.10.0
libtpu: 0.0.40
codegen_flags: <defaults>
</compile_context>

<pallas_src>
import functools

import jax
import jax.numpy as jnp
import numpy as np
from jax import lax
from jax.experimental import pallas as pl
from jax.experimental.pallas import tpu as pltpu

_MAX_BLOCK_ROWS = 1024  # 1024*128 f32 = 512 KiB per in/out block; double-buffered
                        # in+out ~2 MiB -> well inside every scoped-VMEM default
                        # (32 MiB v7x, 16-32 MiB v5e/v6e) while amortizing the
                        # ~0.35 us per-grid-step overhead.


def _window_sum_kernel(x_ref, nxt_ref, o_ref, *, length, chunk_rows):
    """Exact length-`length` sliding-window sum over a lane-dense schedule block.

    x_ref   : VMEM (chunk_rows, 128) f32  -- this chunk's ext rows
    nxt_ref : VMEM (num_chunks, 128) f32  -- first ext row of every *next* chunk (resident)
    o_ref   : VMEM (chunk_rows, 128) f32  -- d per timestep

    o[r, l] = sum_{s=1..length} ext_flat[(chunk_base + r) * 128 + l + s]
    """
    c = pl.program_id(0)
    x = x_ref[...]                                    # (chunk_rows, 128)
    xb = nxt_ref[pl.ds(c, 1), :]                      # (1, 128): first row of next chunk

    # xn[r] = ext row following x[r] (next row inside the block, or the
    # cross-chunk boundary row for the last row of the block).
    if chunk_rows > 1:
        xn = jnp.concatenate([x[1:, :], xb], axis=0)
    else:
        xn = jnp.broadcast_to(xb, x.shape)

    lane = lax.broadcasted_iota(jnp.int32, x.shape, 1)
    acc = jnp.zeros(x.shape, jnp.float32)
    # L shifted adds; each shift is one XLU lane roll (of x and of xn) plus a
    # VPU select + add.  All exact f32 -- no incremental drift.
    for s in range(1, length + 1):
        shift = (128 - s) % 128
        a = pltpu.roll(x, shift=shift, axis=1)        # a[r, l] = x[r, (l + s) % 128]
        b = pltpu.roll(xn, shift=shift, axis=1)       # b[r, l] = xn[r, (l + s) % 128]
        acc = acc + jnp.where(lane < 128 - s, a, b)
    o_ref[...] = acc


@functools.partial(jax.jit, static_argnames=("length", "max_block_rows"))
def dopamine_run(fb, hist, *, length, max_block_rows=_MAX_BLOCK_ROWS):
    """Run all T timesteps in ONE (gridded) pallas_call.

    fb   : (T,) f32 per-step dopamine feedback (0.0 = no feedback that step)
    hist : (L,) f32 incoming da_history, newest first
    Returns (new_hist (L,), d after every step (T,)).
    """
    T = fb.shape[0]
    L = length
    assert T >= 1
    # TODO(synk): support L > 128 (window would reach beyond the next lane row).
    assert 1 <= L <= 128, "history length must be in [1, 128]"

    fb = fb.astype(jnp.float32)
    hist = hist.astype(jnp.float32)
    ext = jnp.concatenate([hist[::-1], fb])           # ext[L + t] = fb[t]

    rows_needed = (T + 127) // 128
    if rows_needed <= max_block_rows:
        chunk = rows_needed                           # single block == full array dims
        nchunks = 1
    else:
        chunk = max(8, (max_block_rows // 8) * 8)     # keep (8, 128) block divisibility
        nchunks = (rows_needed + chunk - 1) // chunk
    rows_p = chunk * nchunks

    total = (rows_p + 1) * 128                        # +1 row: "next row" of the last row
    padded = jnp.concatenate([ext, jnp.zeros((total - (T + L),), jnp.float32)])
    rows = padded.reshape(rows_p + 1, 128)
    main = rows[:rows_p]                              # (rows_p, 128), lane-dense schedule
    boundary = rows[chunk::chunk]                     # (nchunks, 128): first row of each next chunk

    kernel = functools.partial(_window_sum_kernel, length=L, chunk_rows=chunk)
    ds2d = pl.pallas_call(
        kernel,
        out_shape=jax.ShapeDtypeStruct((rows_p, 128), jnp.float32),
        grid=(nchunks,),
        in_specs=[
            pl.BlockSpec((chunk, 128), lambda c: (c, 0)),       # this chunk's ext rows
            pl.BlockSpec((nchunks, 128), lambda c: (0, 0)),     # resident boundary rows
        ],
        out_specs=pl.BlockSpec((chunk, 128), lambda c: (c, 0)),  # lane-dense d output
        compiler_params=pltpu.CompilerParams(
            dimension_semantics=("parallel",),        # chunks are independent (v7x megacore)
        ),
    )(main, boundary)

    ds = ds2d.reshape(rows_p * 128)[:T]
    new_hist = ext[T:T + L][::-1]                     # last L schedule values, newest first
    return new_hist, ds


class FlatDopaminergicTissue:
    """JAX/Pallas port of the PyTorch FlatDopaminergicTissue (state-update module)."""

    def __init__(self, name: str, time_window: float = 7.0, dt: float = 1.0):
        self.name = name
        self.dt = float(dt)
        self.length = int(time_window // dt)
        assert 1 <= self.length <= 128
        self.da = 0.0                                  # pending feedback, zeroed after forward
        self.d = jnp.asarray(0.0, jnp.float32)
        # torch initializes da_history as bool zeros; it is promoted to float on
        # the first torch.cat with `da`, so f32 zeros throughout is equivalent.
        self.da_history = jnp.zeros((self.length,), jnp.float32)
        # TODO(synk): axon_set.forward(self.activity()) fan-out omitted (no axons attached).

    def feedback(self, da):
        self.da = float(da)

    def forward(self):
        """Original per-step API. One step is 3 scalar ops, so it runs as plain
        jnp -- launching a T=1 kernel would be pure dispatch overhead."""
        da = jnp.asarray([self.da], jnp.float32)
        self.da_history = jnp.concatenate([da, self.da_history[:-1]])
        self.d = jnp.sum(self.da_history)
        self.da = 0.0

    def forward_steps(self, fb_schedule):
        """Fused API: run len(fb_schedule) timesteps in ONE gridded pallas_call.

        fb_schedule: array of per-step feedback, or an iterable where None means
        "no feedback this step" (equivalent to 0.0 because the reference zeroes
        `da` after every forward). Returns d after every step, shape (T,)."""
        if isinstance(fb_schedule, (list, tuple)):
            fb = np.asarray([0.0 if v is None else float(v) for v in fb_schedule],
                            np.float32)
        else:
            fb = np.asarray(fb_schedule, np.float32)
        if fb.size == 0:
            return jnp.zeros((0,), jnp.float32)
        new_hist, ds = dopamine_run(jnp.asarray(fb), self.da_history,
                                    length=self.length)
        self.da_history = new_hist
        self.d = ds[-1]
        self.da = 0.0                                  # AbstractDopaminergicTissue.forward zeroes da
        return ds

    def activity(self):
        return self.d

    def reset(self):
        self.da_history = jnp.zeros((self.length,), jnp.float32)
        self.da = 0.0
        self.d = jnp.asarray(0.0, jnp.float32)


def _reference(length, feedback_schedule):
    """Pure-numpy reference mirroring the torch module semantics (f32)."""
    hist = np.zeros(length, np.float32)
    da = np.float32(0.0)
    ds = []
    for fb in feedback_schedule:
        if fb is not None:
            da = np.float32(fb)
        hist = np.concatenate([[da], hist[:-1]]).astype(np.float32)
        ds.append(hist.sum(dtype=np.float32))
        da = np.float32(0.0)
    return hist, np.asarray(ds, np.float32)


if __name__ == "__main__":
    # --- small schedule through the module API (time_window=7, dt=1 -> L=7, T=10) ---
    tissue = FlatDopaminergicTissue("dopa", time_window=7.0, dt=1.0)
    key = jax.random.PRNGKey(0)
    fb_vals = jax.random.uniform(key, (10,), minval=-1.0, maxval=1.0)
    schedule = [float(fb_vals[i]) if i % 3 != 2 else None for i in range(10)]

    ds_small = tissue.forward_steps(schedule)          # ONE pallas_call, all 10 steps
    jax.block_until_ready(ds_small)
    ref_hist, ref_ds = _reference(tissue.length, schedule)
    np.testing.assert_allclose(np.asarray(tissue.da_history), ref_hist, rtol=1e-5, atol=1e-5)
    np.testing.assert_allclose(np.asarray(ds_small), ref_ds, rtol=1e-5, atol=1e-5)

    # --- longer schedule (T=4000): multi-row lane-dense blocks ---
    key2 = jax.random.PRNGKey(1)
    fb_long = np.asarray(jax.random.uniform(key2, (4000,), minval=-1.0, maxval=1.0),
                         np.float32)
    tissue_long = FlatDopaminergicTissue("dopa_long", time_window=7.0, dt=1.0)
    ds_long = tissue_long.forward_steps(fb_long)
    jax.block_until_ready(ds_long)
    ref_hist_l, ref_ds_l = _reference(7, list(fb_long))
    np.testing.assert_allclose(np.asarray(tissue_long.da_history), ref_hist_l, rtol=1e-5, atol=1e-5)
    np.testing.assert_allclose(np.asarray(ds_long), ref_ds_l, rtol=1e-5, atol=1e-5)

    # --- same schedule forced through the multi-chunk grid path (4 chunks of 8 rows) ---
    hist_c, ds_c = dopamine_run(jnp.asarray(fb_long), jnp.zeros((7,), jnp.float32),
                                length=7, max_block_rows=8)
    jax.block_until_ready(ds_c)
    np.testing.assert_allclose(np.asarray(hist_c), ref_hist_l, rtol=1e-5, atol=1e-5)
    np.testing.assert_allclose(np.asarray(ds_c), ref_ds_l, rtol=1e-5, atol=1e-5)

    # --- original per-step API (feedback + forward each step) still matches ---
    tissue2 = FlatDopaminergicTissue("dopa2", time_window=7.0, dt=1.0)
    ds_step = []
    for fb in schedule:
        if fb is not None:
            tissue2.feedback(fb)
        tissue2.forward()
        ds_step.append(float(tissue2.d))
    np.testing.assert_allclose(np.asarray(tissue2.da_history), ref_hist, rtol=1e-5, atol=1e-5)
    np.testing.assert_allclose(np.asarray(ds_step, dtype=np.float32), ref_ds, rtol=1e-5, atol=1e-5)

    print("KERNEL_OK")
</pallas_src>

<mosaic_0001>
module attributes {stable_mosaic.version = 11 : i64} {
  func.func @_window_sum_kernel(%arg0: i32, %arg1: memref<1x128xf32, #tpu.memory_space<vmem>>, %arg2: memref<1x128xf32, #tpu.memory_space<vmem>>, %arg3: memref<1x128xf32, #tpu.memory_space<vmem>>) attributes {dimension_semantics = [#tpu.dimension_semantics<parallel>], iteration_bounds = array<i64: 1>, scalar_prefetch = 0 : i64, scratch_operands = 0 : i64, tpu.core_type = #tpu.core_type<tc>, window_params = [{transform_indices = @transform_0, window_bounds = array<i64: 1, 128>}, {pipeline_mode = #tpu.pipeline_mode<synchronous>, transform_indices = @transform_1, window_bounds = array<i64: 1, 128>}, {transform_indices = @transform_2, window_bounds = array<i64: 1, 128>}]} {
    %c0 = arith.constant 0 : index
    %c0_0 = arith.constant 0 : index
    %0 = vector.load %arg1[%c0, %c0_0] : memref<1x128xf32, #tpu.memory_space<vmem>>, vector<1x128xf32>
    %1 = arith.index_cast %arg0 : i32 to index
    %c0_1 = arith.constant 0 : index
    %2 = vector.load %arg2[%1, %c0_1] : memref<1x128xf32, #tpu.memory_space<vmem>>, vector<1x128xf32>
    %3 = tpu.iota {dimensions = array<i32: 1>} : vector<1x128xi32>
    %cst = arith.constant 0.000000e+00 : f32
    %4 = vector.broadcast %cst : f32 to vector<1x128xf32>
    %c127_i32 = arith.constant 127 : i32
    %5 = tpu.dynamic_rotate %0 by %c127_i32 dim 1 : vector<1x128xf32>, i32 -> vector<1x128xf32>
    %c127_i32_2 = arith.constant 127 : i32
    %6 = tpu.dynamic_rotate %2 by %c127_i32_2 dim 1 : vector<1x128xf32>, i32 -> vector<1x128xf32>
    %c127_i32_3 = arith.constant 127 : i32
    %7 = vector.broadcast %c127_i32_3 : i32 to vector<1x128xi32>
    %8 = arith.cmpi slt, %3, %7 : vector<1x128xi32>
    %9 = arith.select %8, %5, %6 : vector<1x128xi1>, vector<1x128xf32>
    %10 = arith.addf %4, %9 : vector<1x128xf32>
    %c126_i32 = arith.constant 126 : i32
    %11 = tpu.dynamic_rotate %0 by %c126_i32 dim 1 : vector<1x128xf32>, i32 -> vector<1x128xf32>
    %c126_i32_4 = arith.constant 126 : i32
    %12 = tpu.dynamic_rotate %2 by %c126_i32_4 dim 1 : vector<1x128xf32>, i32 -> vector<1x128xf32>
    %c126_i32_5 = arith.constant 126 : i32
    %13 = vector.broadcast %c126_i32_5 : i32 to vector<1x128xi32>
    %14 = arith.cmpi slt, %3, %13 : vector<1x128xi32>
    %15 = arith.select %14, %11, %12 : vector<1x128xi1>, vector<1x128xf32>
    %16 = arith.addf %10, %15 : vector<1x128xf32>
    %c125_i32 = arith.constant 125 : i32
    %17 = tpu.dynamic_rotate %0 by %c125_i32 dim 1 : vector<1x128xf32>, i32 -> vector<1x128xf32>
    %c125_i32_6 = arith.constant 125 : i32
    %18 = tpu.dynamic_rotate %2 by %c125_i32_6 dim 1 : vector<1x128xf32>, i32 -> vector<1x128xf32>
    %c125_i32_7 = arith.constant 125 : i32
    %19 = vector.broadcast %c125_i32_7 : i32 to vector<1x128xi32>
    %20 = arith.cmpi slt, %3, %19 : vector<1x128xi32>
    %21 = arith.select %20, %17, %18 : vector<1x128xi1>, vector<1x128xf32>
    %22 = arith.addf %16, %21 : vector<1x128xf32>
    %c124_i32 = arith.constant 124 : i32
    %23 = tpu.dynamic_rotate %0 by %c124_i32 dim 1 : vector<1x128xf32>, i32 -> vector<1x128xf32>
    %c124_i32_8 = arith.constant 124 : i32
    %24 = tpu.dynamic_rotate %2 by %c124_i32_8 dim 1 : vector<1x128xf32>, i32 -> vector<1x128xf32>
    %c124_i32_9 = arith.constant 124 : i32
    %25 = vector.broadcast %c124_i32_9 : i32 to vector<1x128xi32>
    %26 = arith.cmpi slt, %3, %25 : vector<1x128xi32>
    %27 = arith.select %26, %23, %24 : vector<1x128xi1>, vector<1x128xf32>
    %28 = arith.addf %22, %27 : vector<1x128xf32>
    %c123_i32 = arith.constant 123 : i32
    %29 = tpu.dynamic_rotate %0 by %c123_i32 dim 1 : vector<1x128xf32>, i32 -> vector<1x128xf32>
    %c123_i32_10 = arith.constant 123 : i32
    %30 = tpu.dynamic_rotate %2 by %c123_i32_10 dim 1 : vector<1x128xf32>, i32 -> vector<1x128xf32>
    %c123_i32_11 = arith.constant 123 : i32
    %31 = vector.broadcast %c123_i32_11 : i32 to vector<1x128xi32>
    %32 = arith.cmpi slt, %3, %31 : vector<1x128xi32>
    %33 = arith.select %32, %29, %30 : vector<1x128xi1>, vector<1x128xf32>
    %34 = arith.addf %28, %33 : vector<1x128xf32>
    %c122_i32 = arith.constant 122 : i32
    %35 = tpu.dynamic_rotate %0 by %c122_i32 dim 1 : vector<1x128xf32>, i32 -> vector<1x128xf32>
    %c122_i32_12 = arith.constant 122 : i32
    %36 = tpu.dynamic_rotate %2 by %c122_i32_12 dim 1 : vector<1x128xf32>, i32 -> vector<1x128xf32>
    %c122_i32_13 = arith.constant 122 : i32
    %37 = vector.broadcast %c122_i32_13 : i32 to vector<1x128xi32>
    %38 = arith.cmpi slt, %3, %37 : vector<1x128xi32>
    %39 = arith.select %38, %35, %36 : vector<1x128xi1>, vector<1x128xf32>
    %40 = arith.addf %34, %39 : vector<1x128xf32>
    %c121_i32 = arith.constant 121 : i32
    %41 = tpu.dynamic_rotate %0 by %c121_i32 dim 1 : vector<1x128xf32>, i32 -> vector<1x128xf32>
    %c121_i32_14 = arith.constant 121 : i32
    %42 = tpu.dynamic_rotate %2 by %c121_i32_14 dim 1 : vector<1x128xf32>, i32 -> vector<1x128xf32>
    %c121_i32_15 = arith.constant 121 : i32
    %43 = vector.broadcast %c121_i32_15 : i32 to vector<1x128xi32>
    %44 = arith.cmpi slt, %3, %43 : vector<1x128xi32>
    %45 = arith.select %44, %41, %42 : vector<1x128xi1>, vector<1x128xf32>
    %46 = arith.addf %40, %45 : vector<1x128xf32>
    %c0_16 = arith.constant 0 : index
    %c0_17 = arith.constant 0 : index
    %47 = vector.load %arg3[%c0_16, %c0_17] : memref<1x128xf32, #tpu.memory_space<vmem>>, vector<1x128xf32>
    tpu.vector_store %arg3[%c0_16, %c0_17], %46 {strides = array<i32>} : memref<1x128xf32, #tpu.memory_space<vmem>>, vector<1x128xf32>,
    return
  }
  func.func @transform_0(%arg0: i32) -> (i32, i32) {
    %c0_i32 = arith.constant 0 : i32
    %c0_i32_0 = arith.constant 0 : i32
    return %arg0, %c0_i32 : i32, i32
  }
  func.func @transform_1(%arg0: i32) -> (i32, i32) {
    %c0_i32 = arith.constant 0 : i32
    %c0_i32_0 = arith.constant 0 : i32
    %c0_i32_1 = arith.constant 0 : i32
    return %c0_i32, %c0_i32_0 : i32, i32
  }
  func.func @transform_2(%arg0: i32) -> (i32, i32) {
    %c0_i32 = arith.constant 0 : i32
    %c0_i32_0 = arith.constant 0 : i32
    return %arg0, %c0_i32 : i32, i32
  }
}

</mosaic_0001>

<bundles_post_ra>
// kernel: dopamine_run.1
= control target key start
LH: loop header
LB: loop body
LE: loop exit
PB: predicated region body
PF: predicated region fallthrough
CT: control target
= control target key end

     0   :  { %s76_s11 = smov 126   ;;  %s77_s12 = smov 127   ;;  %v13_v4 = vlaneseq  ;;  %s107_s0 = inlined_call_operand.vmem [shape: f32[1,128], index: 0, kind: input, shape index: {}]   ;;  %s108_s1 = inlined_call_operand.vmem [shape: f32[1,128], index: 1, kind: input, shape index: {}]   ;;  %s109_s2 = inlined_call_operand.vmem [shape: f32[1,128], index: 2, kind: output, shape index: {}]  }
   0x1   :  { %v11_v0 = vld [vmem:[%s107_s0] sm:$0x1]  ;;  %s78_s15 = smov 125   ;;  %s79_s16 = smov 124  }
   0x2   :  { %22 = vrot.lane.b32.xlu1 %v11_v0, %s76_s11  ;;  %15 = vrot.lane.b32.xlu0 %v11_v0, %s77_s12  ;;  %v12_v1 = vld [vmem:[%s108_s1] sm:$0x1]  ;;  %s80_s17 = smov 123   ;;  %s81_s0 = smov 122   ;;  %v14_v7 = vand.u32 127, %v13_v4 }
   0x3   :  { %s82_s18 = smov 121  }
   0x4   :  { %vm26_vm0 = vcmp.lt.s32.totalorder %v14_v7, 126  ;;  %vm19_vm1 = vcmp.lt.s32.totalorder %v14_v7, 127  ;;  %vm33_vm2 = vcmp.lt.s32.totalorder %v14_v7, 125  ;;  %vm40_vm3 = vcmp.lt.s32.totalorder %v14_v7, 124 }
   0x5   :  { %vm47_vm4 = vcmp.lt.s32.totalorder %v14_v7, 123  ;;  %vm54_vm5 = vcmp.lt.s32.totalorder %v14_v7, 122  ;;  %vm61_vm6 = vcmp.lt.s32.totalorder %v14_v7, 121 }
   0x6   :  { %24 = vrot.lane.b32.xlu1 %v12_v1, %s76_s11  ;;  %17 = vrot.lane.b32.xlu0 %v12_v1, %s77_s12 }
   0xa   :  { %31 = vrot.lane.b32.xlu1 %v12_v1, %s78_s15  ;;  %29 = vrot.lane.b32.xlu0 %v11_v0, %s78_s15 }
   0xe   :  { %38 = vrot.lane.b32.xlu1 %v12_v1, %s79_s16  ;;  %36 = vrot.lane.b32.xlu0 %v11_v0, %s79_s16 }
  0x12   :  { %45 = vrot.lane.b32.xlu1 %v12_v1, %s80_s17  ;;  %43 = vrot.lane.b32.xlu0 %v11_v0, %s80_s17 }
  0x16   :  { %52 = vrot.lane.b32.xlu1 %v12_v1, %s81_s0  ;;  %50 = vrot.lane.b32.xlu0 %v11_v0, %s81_s0 }
  0x1a   :  { %59 = vrot.lane.b32.xlu1 %v12_v1, %s82_s18  ;;  %57 = vrot.lane.b32.xlu0 %v11_v0, %s82_s18 }
  0x74   :  { %v23_v2 = vpop.permute.xlu1 %22  ;;  %v16_v3 = vpop.permute.xlu0 %15 }
  0x78   :  { %v25_v5 = vpop.permute.xlu1 %24  ;;  %v18_v6 = vpop.permute.xlu0 %17 }
  0x79   :  { %v27_v12 = vsel %vm26_vm0, %v23_v2, %v25_v5  ;;  %v20_v13 = vsel %vm19_vm1, %v16_v3, %v18_v6 }
  0x7a   :  { %v28_v15 = vadd.f32 %v27_v12, %v20_v13 }
  0x7c   :  { %v32_v8 = vpop.permute.xlu1 %31  ;;  %v30_v9 = vpop.permute.xlu0 %29 }
  0x7d   :  { %v34_v14 = vsel %vm33_vm2, %v30_v9, %v32_v8 }
  0x7e   :  { %v35_v19 = vadd.f32 %v34_v14, %v28_v15 }
  0x80   :  { %v39_v10 = vpop.permute.xlu1 %38  ;;  %v37_v11 = vpop.permute.xlu0 %36 }
  0x81   :  { %v41_v18 = vsel %vm40_vm3, %v37_v11, %v39_v10 }
  0x82   :  { %v42_v21 = vadd.f32 %v41_v18, %v35_v19 }
  0x84   :  { %v46_v16 = vpop.permute.xlu1 %45  ;;  %v44_v17 = vpop.permute.xlu0 %43 }
  0x85   :  { %v48_v20 = vsel %vm47_vm4, %v44_v17, %v46_v16 }
  0x86   :  { %v49_v25 = vadd.f32 %v48_v20, %v42_v21 }
  0x88   :  { %v53_v22 = vpop.permute.xlu1 %52  ;;  %v51_v23 = vpop.permute.xlu0 %50 }
  0x89   :  { %v55_v24 = vsel %vm54_vm5, %v51_v23, %v53_v22 }
  0x8a   :  { %v56_v26 = vadd.f32 %v55_v24, %v49_v25 }
  0x8c   :  { %v60_v27 = vpop.permute.xlu1 %59  ;;  %v58_v28 = vpop.permute.xlu0 %57 }
  0x8d   :  { %v62_v29 = vsel %vm61_vm6, %v58_v28, %v60_v27 }
  0x8e   :  { %v63_v30 = vadd.f32 %v62_v29, %v56_v26 }
  0x90   :  { %64 = vst [vmem:[%s109_s2] sm:$0x1] %v63_v30 }

</bundles_post_ra>
